<compile_context>
chip_gen: v7x
topology: tpu7x:2x2x1
jax: 0.10.0
libtpu: 0.0.40
codegen_flags: <defaults>
</compile_context>

<pallas_src>
import jax
import jax.numpy as jnp
from jax.experimental import pallas as pl
from jax.experimental.pallas import tpu as pltpu


_LANES = 128
_WIDE_LANES = 512
_TARGET_BLOCK_BYTES = 4 * 1024 * 1024     # ~4 MiB blocks
_MIN_GRID_STEPS = 4                        # keep a few steps for TC sharding
_VMEM_LIMIT_BYTES = 32 * 1024 * 1024       # 16 MiB pipeline + headroom, all gens


def _soft_exp_kernel(alpha_ref, x_ref, o_ref):
    # alpha_ref: (1, 1) f32 scalar in SMEM; x_ref / o_ref: (tile_rows, lanes)
    # tiles in VMEM (native dtype; compute upcast to f32 in-kernel).
    alpha = alpha_ref[0, 0]

    @pl.when(alpha == 0.0)
    def _():
        o_ref[...] = x_ref[...]

    @pl.when(alpha < 0.0)
    def _():
        x = x_ref[...].astype(jnp.float32)
        inv_a = 1.0 / alpha  # scalar reciprocal once; vector work is a VPU mul
        o_ref[...] = (-(jnp.log(1.0 - alpha * (x + alpha))) * inv_a).astype(o_ref.dtype)

    # Catch-all: alpha > 0 or alpha is NaN (matches PyTorch's `else`), so the
    # output block is written for every possible alpha value.
    @pl.when(jnp.logical_not(jnp.logical_or(alpha == 0.0, alpha < 0.0)))
    def _():
        x = x_ref[...].astype(jnp.float32)
        inv_a = 1.0 / alpha
        o_ref[...] = ((jnp.exp(alpha * x) - 1.0) * inv_a + alpha).astype(o_ref.dtype)


def _soft_exp_jnp(alpha, x):
    """Pure-JAX soft_exp for the tiny (<lanes) ragged tail; handles traced alpha."""
    a = jnp.asarray(alpha, jnp.float32)
    xf = x.astype(jnp.float32)
    safe_a = jnp.where(a == 0.0, 1.0, a)
    pos = (jnp.exp(a * xf) - 1.0) / safe_a + a
    neg = -jnp.log(1.0 - a * (xf + a)) / safe_a
    out = jnp.where(a == 0.0, xf, jnp.where(a < 0.0, neg, pos))
    return out.astype(x.dtype)


def soft_exponential(x, alpha):
    """Elementwise soft-exponential activation via a Pallas TPU kernel.

    x: arbitrary-shaped float array (e.g. NCHW), kept in its native dtype.
    alpha: scalar parameter (learnable in the reference module; may be traced).
    """
    orig_shape = x.shape
    dtype = x.dtype

    # Static-alpha fast path: alpha == 0.0 is the module default; the kernel
    # would just memcpy HBM->VMEM->HBM.  Only applies to concrete alpha.
    try:
        if float(alpha) == 0.0:
            return x
    except Exception:  # tracer (or otherwise non-concrete) alpha: fall through
        pass

    n = 1
    for d in orig_shape:
        n *= d
    if n == 0:
        return x

    itemsize = jnp.dtype(dtype).itemsize
    # Minimum sublane multiple for this dtype's packed tiling
    # (f32: 8, bf16/f16: 16, int8/fp8: 32).
    sublanes = max(8, 32 // itemsize)
    lanes = _WIDE_LANES if n % _WIDE_LANES == 0 else _LANES

    alpha_arr = jnp.asarray(alpha, jnp.float32).reshape(1, 1)

    xf = x.reshape(n)
    r = n % lanes
    n_main = n - r

    tail_out = None
    if r:
        # TODO(synk): fold this <lanes remainder into the kernel with a masked
        # store instead of a wrapper-side slice + concat.
        main = jax.lax.slice_in_dim(xf, 0, n_main)
        tail = jax.lax.slice_in_dim(xf, n_main, n)
        tail_out = _soft_exp_jnp(alpha_arr[0, 0], tail)
    else:
        main = xf  # pure metadata reshape below; no pad, no copy

    if n_main == 0:
        out = tail_out
    else:
        rows = n_main // lanes
        x2d = main.reshape(rows, lanes)

        max_tile_rows = max(sublanes, _TARGET_BLOCK_BYTES // (lanes * itemsize))
        max_tile_rows = (max_tile_rows // sublanes) * sublanes

        if rows <= max_tile_rows:
            # Single block covering the whole slab; block dim == full array dim,
            # so the (8, 128) divisibility rule is trivially satisfied.
            tile_rows = rows
        else:
            # Keep >= _MIN_GRID_STEPS blocks so the "parallel" grid axis has
            # work to shard across TensorCores, then round to sublane multiple.
            tile_rows = min(max_tile_rows, -(-rows // _MIN_GRID_STEPS))
            tile_rows = max(sublanes, -(-tile_rows // sublanes) * sublanes)
            tile_rows = min(tile_rows, max_tile_rows)

        grid = (pl.cdiv(rows, tile_rows),)  # ragged last row-block is masked by Pallas

        out2d = pl.pallas_call(
            _soft_exp_kernel,
            out_shape=jax.ShapeDtypeStruct((rows, lanes), dtype),
            grid_spec=pltpu.PrefetchScalarGridSpec(
                num_scalar_prefetch=0,
                grid=grid,
                in_specs=[
                    pl.BlockSpec(memory_space=pltpu.SMEM),                # alpha scalar
                    pl.BlockSpec((tile_rows, lanes), lambda i: (i, 0)),   # x tile
                ],
                out_specs=pl.BlockSpec((tile_rows, lanes), lambda i: (i, 0)),
            ),
            compiler_params=pltpu.CompilerParams(
                # TODO(synk): try pltpu.CORE_PARALLEL on v7x (2 TCs/chip) once
                # verified safe on single-TC generations.
                dimension_semantics=("parallel",),
                vmem_limit_bytes=_VMEM_LIMIT_BYTES,
            ),
        )(alpha_arr, x2d)

        main_out = out2d.reshape(n_main)
        out = main_out if tail_out is None else jnp.concatenate([main_out, tail_out])

    return out.reshape(orig_shape)


def _soft_exp_ref(alpha, x):
    # Pure-JAX reference mirroring the PyTorch helper (alpha is a concrete float).
    if alpha == 0.0:
        return x
    elif alpha < 0.0:
        return -jnp.log(1.0 - alpha * (x + alpha)) / alpha
    else:
        return (jnp.exp(alpha * x) - 1.0) / alpha + alpha


if __name__ == "__main__":
    key = jax.random.PRNGKey(0)
    x = jax.random.normal(key, (2, 4, 16, 16), dtype=jnp.float32)

    # Exercise all three alpha branches with concrete alpha (module default 0.0
    # takes the static fast path; alpha=-0.1 keeps the log argument positive
    # for standard-normal x).
    for alpha in (0.5, -0.1, 0.0):
        out = jax.block_until_ready(soft_exponential(x, alpha))
        ref = _soft_exp_ref(alpha, x)
        assert out.shape == x.shape and out.dtype == x.dtype
        assert jnp.allclose(out, ref, atol=1e-5, rtol=1e-5), f"mismatch at alpha={alpha}"

    # Traced (runtime) alpha: exercises the in-kernel pl.when branches,
    # including the alpha == 0 identity path inside the kernel.
    jitted = jax.jit(soft_exponential)
    for alpha in (0.5, -0.1, 0.0):
        out = jax.block_until_ready(jitted(x, jnp.float32(alpha)))
        ref = _soft_exp_ref(alpha, x)
        assert jnp.allclose(out, ref, atol=1e-5, rtol=1e-5), f"traced mismatch at alpha={alpha}"

    # Non-lane-aligned shape: main slab through the kernel + tiny pure-JAX tail.
    x_odd = jax.random.normal(jax.random.PRNGKey(1), (3, 7, 19), dtype=jnp.float32)
    out = jax.block_until_ready(soft_exponential(x_odd, 0.5))
    ref = _soft_exp_ref(0.5, x_odd)
    assert out.shape == x_odd.shape
    assert jnp.allclose(out, ref, atol=1e-5, rtol=1e-5), "mismatch on unaligned shape"

    print("KERNEL_OK")
</pallas_src>

<mosaic_0001>
module attributes {stable_mosaic.version = 11 : i64} {
  func.func @_soft_exp_kernel(%arg0: i32, %arg1: memref<1x1xf32, #tpu.memory_space<smem>>, %arg2: memref<4x512xf32, #tpu.memory_space<vmem>>, %arg3: memref<4x512xf32, #tpu.memory_space<vmem>>) attributes {dimension_semantics = [#tpu.dimension_semantics<parallel>], iteration_bounds = array<i64: 1>, scalar_prefetch = 0 : i64, scratch_operands = 0 : i64, tpu.core_type = #tpu.core_type<tc>, window_params = [{transform_indices = @transform_0, window_bounds = array<i64: 1, 1>}, {transform_indices = @transform_1, window_bounds = array<i64: 4, 512>}, {transform_indices = @transform_2, window_bounds = array<i64: 4, 512>}]} {
    %c0 = arith.constant 0 : index
    %c0_0 = arith.constant 0 : index
    %0 = memref.load %arg1[%c0, %c0_0] : memref<1x1xf32, #tpu.memory_space<smem>>
    %cst = arith.constant 0.000000e+00 : f32
    %1 = arith.cmpf oeq, %0, %cst : f32
    %2 = arith.extui %1 : i1 to i32
    %c0_i32 = arith.constant 0 : i32
    %3 = arith.cmpi ne, %2, %c0_i32 : i32
    scf.if %3 {
      %c0_6 = arith.constant 0 : index
      %c0_7 = arith.constant 0 : index
      %13 = vector.load %arg2[%c0_6, %c0_7] : memref<4x512xf32, #tpu.memory_space<vmem>>, vector<4x512xf32>
      %c0_8 = arith.constant 0 : index
      %c0_9 = arith.constant 0 : index
      %14 = vector.load %arg3[%c0_8, %c0_9] : memref<4x512xf32, #tpu.memory_space<vmem>>, vector<4x512xf32>
      tpu.vector_store %arg3[%c0_8, %c0_9], %13 {strides = array<i32>} : memref<4x512xf32, #tpu.memory_space<vmem>>, vector<4x512xf32>,
    } else {
    }
    %cst_1 = arith.constant 0.000000e+00 : f32
    %4 = arith.cmpf olt, %0, %cst_1 : f32
    %5 = arith.extui %4 : i1 to i32
    %c0_i32_2 = arith.constant 0 : i32
    %6 = arith.cmpi ne, %5, %c0_i32_2 : i32
    scf.if %6 {
      %c0_6 = arith.constant 0 : index
      %c0_7 = arith.constant 0 : index
      %13 = vector.load %arg2[%c0_6, %c0_7] : memref<4x512xf32, #tpu.memory_space<vmem>>, vector<4x512xf32>
      %cst_8 = arith.constant 1.000000e+00 : f32
      %14 = arith.divf %cst_8, %0 : f32
      %15 = vector.broadcast %0 : f32 to vector<4x512xf32>
      %16 = arith.addf %13, %15 : vector<4x512xf32>
      %17 = vector.broadcast %0 : f32 to vector<4x512xf32>
      %18 = arith.mulf %17, %16 : vector<4x512xf32>
      %cst_9 = arith.constant 1.000000e+00 : f32
      %19 = vector.broadcast %cst_9 : f32 to vector<4x512xf32>
      %20 = arith.subf %19, %18 : vector<4x512xf32>
      %21 = math.log %20 : vector<4x512xf32>
      %cst_10 = arith.constant 0.000000e+00 : f32
      %22 = vector.broadcast %cst_10 : f32 to vector<4x512xf32>
      %23 = arith.subf %22, %21 : vector<4x512xf32>
      %24 = vector.broadcast %14 : f32 to vector<4x512xf32>
      %25 = arith.mulf %23, %24 : vector<4x512xf32>
      %c0_11 = arith.constant 0 : index
      %c0_12 = arith.constant 0 : index
      %26 = vector.load %arg3[%c0_11, %c0_12] : memref<4x512xf32, #tpu.memory_space<vmem>>, vector<4x512xf32>
      tpu.vector_store %arg3[%c0_11, %c0_12], %25 {strides = array<i32>} : memref<4x512xf32, #tpu.memory_space<vmem>>, vector<4x512xf32>,
    } else {
    }
    %cst_3 = arith.constant 0.000000e+00 : f32
    %7 = arith.cmpf oeq, %0, %cst_3 : f32
    %cst_4 = arith.constant 0.000000e+00 : f32
    %8 = arith.cmpf olt, %0, %cst_4 : f32
    %9 = arith.ori %7, %8 : i1
    %true = arith.constant true
    %10 = arith.xori %9, %true : i1
    %11 = arith.extui %10 : i1 to i32
    %c0_i32_5 = arith.constant 0 : i32
    %12 = arith.cmpi ne, %11, %c0_i32_5 : i32
    scf.if %12 {
      %c0_6 = arith.constant 0 : index
      %c0_7 = arith.constant 0 : index
      %13 = vector.load %arg2[%c0_6, %c0_7] : memref<4x512xf32, #tpu.memory_space<vmem>>, vector<4x512xf32>
      %cst_8 = arith.constant 1.000000e+00 : f32
      %14 = arith.divf %cst_8, %0 : f32
      %15 = vector.broadcast %0 : f32 to vector<4x512xf32>
      %16 = arith.mulf %15, %13 : vector<4x512xf32>
      %17 = math.exp %16 : vector<4x512xf32>
      %cst_9 = arith.constant 1.000000e+00 : f32
      %18 = vector.broadcast %cst_9 : f32 to vector<4x512xf32>
      %19 = arith.subf %17, %18 : vector<4x512xf32>
      %20 = vector.broadcast %14 : f32 to vector<4x512xf32>
      %21 = arith.mulf %19, %20 : vector<4x512xf32>
      %22 = vector.broadcast %0 : f32 to vector<4x512xf32>
      %23 = arith.addf %21, %22 : vector<4x512xf32>
      %c0_10 = arith.constant 0 : index
      %c0_11 = arith.constant 0 : index
      %24 = vector.load %arg3[%c0_10, %c0_11] : memref<4x512xf32, #tpu.memory_space<vmem>>, vector<4x512xf32>
      tpu.vector_store %arg3[%c0_10, %c0_11], %23 {strides = array<i32>} : memref<4x512xf32, #tpu.memory_space<vmem>>, vector<4x512xf32>,
    } else {
    }
    return
  }
  func.func @transform_0(%arg0: i32) -> (i32, i32) {
    %c0_i32 = arith.constant 0 : i32
    %c0_i32_0 = arith.constant 0 : i32
    %c0_i32_1 = arith.constant 0 : i32
    return %c0_i32, %c0_i32_0 : i32, i32
  }
  func.func @transform_1(%arg0: i32) -> (i32, i32) {
    %c0_i32 = arith.constant 0 : i32
    %c0_i32_0 = arith.constant 0 : i32
    return %arg0, %c0_i32 : i32, i32
  }
  func.func @transform_2(%arg0: i32) -> (i32, i32) {
    %c0_i32 = arith.constant 0 : i32
    %c0_i32_0 = arith.constant 0 : i32
    return %arg0, %c0_i32 : i32, i32
  }
}

</mosaic_0001>

<bundles_post_ra>
// kernel: tpu_custom_call.1
= control target key start
LH: loop header
LB: loop body
LE: loop exit
PB: predicated region body
PF: predicated region fallthrough
CT: control target
= control target key end

     0   :  { %8 = vsyncpa [#allocation4], 0  ;;  %s238_s0 = inlined_call_operand.<no memory space> [shape: f32[1,1], index: 0, kind: input, shape index: {}]   ;;  %s239_s1 = inlined_call_operand.hbm [shape: f32[4,512], index: 1, kind: input, shape index: {}]   ;;  %s240_s2 = inlined_call_operand.hbm [shape: f32[4,512], index: 2, kind: output, shape index: {}]  }
   0x1   :  { %9 = vsyncpa [#allocation5], 0  ;;  %s169_s9 = smov [#allocation3]   ;;  %s121_s13 = scalar_lea.hbm %s239_s1, 256 }
   0x2   :  { %s18_s10 = sshll.u32 %s169_s9, 4  ;;  %p122_p0 = scmp.ne.s32.totalorder %s239_s1, %s121_s13  ;;  %s19_s10 = int_to_ptr.vmem [resolvable:$true] %s18_s10 }
   0x3   :  { %p125_p1 = scmp.lt.u32.totalorder %s121_s13, %s239_s1 }
   0x5   :  { %p127_p2 = pnand %p125_p1, %p122_p0 }
   0x7   :  { %130 = shalt.err (!%p127_p2)
}
   0x8   :  { %s131_s18 = scalar_lea.vmem %s19_s10, 256  ;;  %p136_p4 = scmp.lt.s32.totalorder %s19_s10, %s19_s10 }
   0x9   :  { %p132_p3 = scmp.ne.s32.totalorder %s19_s10, %s131_s18  ;;  %p137_p5 = scmp.lt.s32.totalorder %s131_s18, %s131_s18 }
   0xb   :  { %p138_p6 = por %p137_p5, %p136_p4 }
   0xd   :  { %p139_p7 = pnand %p138_p6, %p132_p3 }
   0xf   :  { %142 = shalt.err (!%p139_p7)
}
  0x10   :  { %21 = dma.hbm_to_vmem [thread:$0]  %s239_s1, 256, %s19_s10, [#allocation4]  }
  0x11   :  { %165 = dma.done.wait [#allocation4], 256  }
  0x12   :  { %166 = vsyncadd [#allocation4], 4294967040  ;;  %p26_p8 = scmp.eq.f32.partialorder %s238_s0, 0.0 }
  0x13   :  { %v30_v0 = vld [vmem:[#allocation3] sm:$0xff] (%p26_p8)  ;;  %v31_v1 = vld [vmem:[#allocation3 + $0x8] sm:$0xff] (%p26_p8) }
  0x14   :  { %29 = sbr.rel (!%p26_p8) target bundleno = 27 (0x1b), region = 17  ;;  %32 = vst [vmem:[#allocation6] sm:$0xff] (%p26_p8), %v30_v0  ;;  %33 = vst [vmem:[#allocation6 + $0x8] sm:$0xff] (%p26_p8), %v31_v1 }
  0x1b PF:  { %p34_p9 = scmp.lt.f32.partialorder %s238_s0, 0.0 }
  0x1c   :  { %v40_v2 = vstv (%p34_p9), %s238_s0  ;;  %v38_v4 = vld [vmem:[#allocation3] sm:$0xff] (%p34_p9)  ;;  %v39_v5 = vld [vmem:[#allocation3 + $0x8] sm:$0xff] (%p34_p9) }
  0x1d   :  { %37 = sbr.rel (!%p34_p9) target bundleno = 94 (0x5e), region = 21  ;;  %109 = vrcp.f32 (%p34_p9), %v40_v2  ;;  %v44_v6 = vadd.f32 (%p34_p9), %v40_v2, %v38_v4  ;;  %v45_v7 = vadd.f32 (%p34_p9), %v40_v2, %v39_v5 }
  0x1f   :  { %v46_v8 = vmul.f32 (%p34_p9), %v44_v6, %v40_v2  ;;  %v47_v9 = vmul.f32 (%p34_p9), %v45_v7, %v40_v2 }
  0x21   :  { %v48_v10 = vsub.f32 (%p34_p9), 1.0, %v46_v8  ;;  %v49_v11 = vsub.f32 (%p34_p9), 1.0, %v47_v9 }
  0x23   :  { %111 = vlog2.f32 (%p34_p9), %v48_v10 }
  0x24   :  { %113 = vlog2.f32 %v49_v11 }
  0x27   :  { %v110_v3 = vpop.eup %109 }
  0x28   :  { %103 = vpush %v110_v3 }
  0x2d   :  { %v112_v12 = vpop.eup %111 }
  0x2e   :  { %v114_v13 = vpop.eup %113  ;;  %v51_v14 = vmul.f32 0.6931472, %v112_v12 }
  0x2f   :  { %v53_v15 = vmul.f32 0.6931472, %v114_v13 }
  0x30   :  { %v54_v16 = vsub.f32 0.0, %v51_v14 }
  0x31   :  { %v55_v17 = vsub.f32 0.0, %v53_v15 }
  0x59   :  { %s104_s30 = spop %103 }
  0x5a   :  { %v56_v18 = vstv %s104_s30 }
  0x5b   :  { %v57_v19 = vmul.f32 %v56_v18, %v54_v16  ;;  %v58_v20 = vmul.f32 %v56_v18, %v55_v17 }
  0x5d   :  { %59 = vst [vmem:[#allocation6] sm:$0xff] %v57_v19  ;;  %60 = vst [vmem:[#allocation6 + $0x8] sm:$0xff] %v58_v20 }
  0x5e PF:  { %p61_p10 = por %p34_p9, %p26_p8 }
  0x5f   :  { %v67_v21 = vstv (!%p61_p10), %s238_s0  ;;  %v65_v23 = vld [vmem:[#allocation3] sm:$0xff] (!%p61_p10)  ;;  %v66_v24 = vld [vmem:[#allocation3 + $0x8] sm:$0xff] (!%p61_p10) }
  0x60   :  { %64 = sbr.rel (%p61_p10) target bundleno = 163 (0xa3), region = 25  ;;  %115 = vrcp.f32 (!%p61_p10), %v67_v21  ;;  %v71_v25 = vmul.f32 (!%p61_p10), %v67_v21, %v65_v23  ;;  %v72_v26 = vmul.f32 (!%p61_p10), %v67_v21, %v66_v24 }
  0x62   :  { %v73_v27 = vmul.f32 (!%p61_p10), 1.442695, %v71_v25  ;;  %v75_v28 = vmul.f32 (!%p61_p10), 1.442695, %v72_v26 }
  0x64   :  { %117 = vpow2.f32 (!%p61_p10), %v73_v27 }
  0x65   :  { %119 = vpow2.f32 (!%p61_p10), %v75_v28 }
  0x6a   :  { %v116_v22 = vpop.eup %115 }
  0x6b   :  { %105 = vpush %v116_v22 }
  0x6e   :  { %v118_v29 = vpop.eup %117 }
  0x6f   :  { %v120_v30 = vpop.eup %119  ;;  %v101_v31 = vadd.f32 -1.0, %v118_v29 }
  0x70   :  { %v102_v32 = vadd.f32 -1.0, %v120_v30 }
  0x9c   :  { %s106_s9 = spop %105 }
  0x9d   :  { %v79_v33 = vstv %s106_s9 }
  0x9e   :  { %v80_v34 = vmul.f32 %v101_v31, %v79_v33  ;;  %v81_v35 = vmul.f32 %v102_v32, %v79_v33 }
  0xa0   :  { %v82_v36 = vadd.f32 %v80_v34, %v67_v21  ;;  %v83_v37 = vadd.f32 %v81_v35, %v67_v21 }
  0xa2   :  { %84 = vst [vmem:[#allocation6] sm:$0xff] %v82_v36  ;;  %85 = vst [vmem:[#allocation6 + $0x8] sm:$0xff] %v83_v37 }
  0xa3 PF:  { %s170_s0 = smov [#allocation6]  }
  0xa4   :  { %s92_s10 = sshll.u32 %s170_s0, 4  ;;  %s93_s10 = int_to_ptr.vmem [resolvable:$true] %s92_s10 }
  0xa5   :  { %s143_s11 = scalar_lea.vmem %s93_s10, 256  ;;  %p148_p12 = scmp.lt.s32.totalorder %s93_s10, %s93_s10 }
  0xa6   :  { %p144_p11 = scmp.ne.s32.totalorder %s93_s10, %s143_s11  ;;  %p149_p13 = scmp.lt.s32.totalorder %s143_s11, %s143_s11 }
  0xa8   :  { %p150_p0 = por %p149_p13, %p148_p12 }
  0xaa   :  { %p151_p1 = pnand %p150_p0, %p144_p11 }
  0xac   :  { %154 = shalt.err (!%p151_p1)
}
  0xad   :  { %s155_s14 = scalar_lea.hbm %s240_s2, 256 }
  0xae   :  { %p156_p2 = scmp.ne.s32.totalorder %s240_s2, %s155_s14  ;;  %p159_p3 = scmp.lt.u32.totalorder %s155_s14, %s240_s2 }
  0xb0   :  { %p161_p4 = pnand %p159_p3, %p156_p2 }
  0xb2   :  { %164 = shalt.err (!%p161_p4)
}
  0xb3   :  { %95 = dma.vmem_to_hbm [thread:$0]  %s93_s10, 256, %s240_s2, [#allocation5]  }
  0xb4   :  { %167 = dma.done.wait [#allocation5], 256  }
  0xb5   :  { %168 = vsyncadd [#allocation5], 4294967040 }
  0xb6   :  { %99 = vsyncpa [#allocation4], 1 }
  0xb7   :  { %100 = vsyncpa [#allocation5], 1 }

</bundles_post_ra>
